<compile_context>
chip_gen: v7x
topology: tpu7x:2x2x1
jax: 0.10.0
libtpu: 0.0.40
codegen_flags: <defaults>
</compile_context>

<pallas_src>
import functools

import jax
import jax.numpy as jnp
from jax import lax
from jax.experimental import pallas as pl
from jax.experimental.pallas import tpu as pltpu

_LANE = 128


def _round_up(a, b):
    return ((a + b - 1) // b) * b


def _min_block_rows(dtype):
    """Min sublane multiple for the dtype's TPU tile: 8 (4B), 16 (2B), 32 (1B)."""
    itemsize = jnp.dtype(dtype).itemsize
    return 8 * max(1, 4 // max(1, itemsize))


def _default_block_rows():
    """8192 rows (4 MiB/buffer f32) on v6e/v7x; 4096 (2 MiB) keeps the 'none'
    path (2 inputs + 1 output, double-buffered) inside v5e's 16 MiB scoped
    VMEM default.  An explicit vmem_limit_bytes is passed in either case."""
    try:
        kind = jax.devices()[0].device_kind.lower()
    except Exception:
        return 4096
    if "v5 lite" in kind or "v5e" in kind or "v5litepod" in kind:
        return 4096
    return 8192


def _focal_loss_math(x, t, *, alpha, gamma):
    """Elementwise focal loss on f32 arrays (numerically stable, algebraically
    trimmed).  Shares e = exp(-|x|) between the stable sigmoid and the stable
    BCE-with-logits term; integer gammas lower to VPU multiplies."""
    e = jnp.exp(-jnp.abs(x))                                # 1 EUP transcendental
    inv = 1.0 / (1.0 + e)
    p = jnp.where(x >= 0, 1.0, e) * inv                     # stable sigmoid
    ce = jnp.maximum(x, 0.0) - x * t + jnp.log1p(e)         # stable BCE w/ logits
    # 1 - p_t = p + t - 2*p*t  (skips p_t and the two (1 - .) subtractions).
    w = p + t - 2.0 * (p * t)
    gamma = float(gamma)
    if gamma.is_integer() and 0.0 <= gamma <= 8.0:
        mod = w ** int(gamma)                               # integer_pow -> muls
    else:
        # Clamp: rounding could make w slightly negative -> NaN under float pow.
        mod = jnp.power(jnp.maximum(w, 0.0), gamma)
    loss = ce * mod
    if alpha >= 0:
        # alpha_t = (1 - alpha) + (2*alpha - 1) * t  (constants fold at trace).
        loss = ((1.0 - alpha) + (2.0 * alpha - 1.0) * t) * loss
    return loss


def _elementwise_kernel(x_ref, t_ref, o_ref, *, alpha, gamma):
    x = x_ref[...].astype(jnp.float32)
    t = t_ref[...].astype(jnp.float32)
    o_ref[...] = _focal_loss_math(x, t, alpha=alpha, gamma=gamma).astype(o_ref.dtype)


def _partial_sum_kernel(x_ref, t_ref, o_ref, *, alpha, gamma, block_rows,
                        rows_total, needs_mask):
    """Fused-reduction kernel: emits an (8, 128) f32 partial sum per block.

    Only the last grid block (which may read out-of-bounds garbage rows) pays
    for masking, and the mask is a single row-iota compare + select.
    """
    x = x_ref[...].astype(jnp.float32)
    t = t_ref[...].astype(jnp.float32)
    loss = _focal_loss_math(x, t, alpha=alpha, gamma=gamma)

    def _write(v):
        # (block_rows, 128) -> (block_rows//8, 8, 128) -> (8, 128): tile-aligned
        # reshape followed by a leading-axis (VPU) reduction.
        o_ref[...] = v.reshape(block_rows // 8, 8, _LANE).sum(axis=0)

    if not needs_mask:
        _write(loss)
    else:
        last = pl.num_programs(0) - 1
        i = pl.program_id(0)

        @pl.when(i != last)
        def _():
            _write(loss)

        @pl.when(i == last)
        def _():
            valid_rows = rows_total - i * block_rows
            row = lax.broadcasted_iota(jnp.int32, (block_rows, _LANE), 0)
            # Keep jnp.where (not a multiply): garbage rows may be NaN/Inf.
            _write(jnp.where(row < valid_rows, loss, 0.0))


def sigmoid_focal_loss(inputs, targets, *, alpha=0.25, gamma=2.0,
                       reduction="none", block_rows=None):
    """Pallas-backed equivalent of SigmoidFocalLoss.forward."""
    if reduction not in ("none", "mean", "sum"):
        raise ValueError(
            f"Invalid Value for arg 'reduction': '{reduction}' \n "
            "Supported reduction modes: 'none', 'mean', 'sum'")
    assert inputs.shape == targets.shape
    orig_shape = inputs.shape
    dtype = inputs.dtype
    alpha = float(alpha)
    gamma = float(gamma)

    x_flat = inputs.reshape(-1)
    t_flat = targets.reshape(-1).astype(dtype)
    n = x_flat.shape[0]

    if n == 0:
        if reduction == "none":
            return jnp.zeros(orig_shape, dtype)
        total = jnp.array(jnp.nan if reduction == "mean" else 0.0, jnp.float32)
        return total.astype(dtype)

    # 128-aligned prefix goes through Pallas; the <128-element tail (if any)
    # is computed in plain JAX.  No full-array jnp.pad / output slice.
    rows = n // _LANE
    n_main = rows * _LANE
    has_tail = n_main != n
    tail_x = x_flat[n_main:] if has_tail else None
    tail_t = t_flat[n_main:] if has_tail else None

    def _tail_loss():
        return _focal_loss_math(tail_x.astype(jnp.float32),
                                tail_t.astype(jnp.float32),
                                alpha=alpha, gamma=gamma)

    if rows == 0:
        # Entire input is smaller than one 128-lane row: pure JAX.
        loss_tail = _tail_loss()
        if reduction == "none":
            return loss_tail.astype(dtype).reshape(orig_shape)
        total = loss_tail.sum()
        if reduction == "mean":
            total = total / n
        return total.astype(dtype)

    # ---- Block sizing -------------------------------------------------------
    if block_rows is None:
        block_rows = _default_block_rows()
    min_rows = _min_block_rows(dtype)

    block_rows = min(int(block_rows), _round_up(rows, min_rows))
    if rows > min_rows:
        # Keep >= 2 grid blocks so both TensorCores on a v7x chip get work
        # under dimension_semantics=("parallel",).
        block_rows = min(block_rows, _round_up(pl.cdiv(rows, 2), min_rows))
    block_rows = max(min_rows, _round_up(block_rows, min_rows))
    num_blocks = pl.cdiv(rows, block_rows)
    grid = (num_blocks,)

    x2 = x_flat[:n_main].reshape(rows, _LANE)
    t2 = t_flat[:n_main].reshape(rows, _LANE)

    itemsize = jnp.dtype(dtype).itemsize
    block_bytes = block_rows * _LANE * itemsize
    n_bufs = 3 if reduction == "none" else 2          # double-buffered arrays
    vmem_bytes = min(2 * n_bufs * block_bytes + (2 << 20), 56 << 20)

    in_specs = [
        pl.BlockSpec((block_rows, _LANE), lambda i: (i, 0)),
        pl.BlockSpec((block_rows, _LANE), lambda i: (i, 0)),
    ]
    compiler_params = pltpu.CompilerParams(
        dimension_semantics=("parallel",),
        vmem_limit_bytes=int(vmem_bytes))

    if reduction == "none":
        kernel = functools.partial(
            _elementwise_kernel, alpha=alpha, gamma=gamma)
        cost = pl.CostEstimate(flops=int(14 * n_main),
                               transcendentals=int(2 * n_main),
                               bytes_accessed=int(3 * n_main * itemsize))
        out2 = pl.pallas_call(
            kernel,
            out_shape=jax.ShapeDtypeStruct((rows, _LANE), dtype),
            grid_spec=pltpu.PrefetchScalarGridSpec(
                num_scalar_prefetch=0,
                grid=grid,
                in_specs=in_specs,
                out_specs=pl.BlockSpec((block_rows, _LANE), lambda i: (i, 0)),
            ),
            compiler_params=compiler_params,
            cost_estimate=cost,
        )(x2, t2)
        loss_flat = out2.reshape(-1)
        if has_tail:
            loss_flat = jnp.concatenate([loss_flat, _tail_loss().astype(dtype)])
        return loss_flat.reshape(orig_shape)

    # ---- 'mean' / 'sum': fused reduction ------------------------------------
    # Per-block (8, 128) f32 partial sums; the full-size loss never hits HBM.
    needs_mask = (num_blocks * block_rows) != rows
    kernel = functools.partial(
        _partial_sum_kernel, alpha=alpha, gamma=gamma,
        block_rows=block_rows, rows_total=rows, needs_mask=needs_mask)
    cost = pl.CostEstimate(flops=int(15 * n_main),
                           transcendentals=int(2 * n_main),
                           bytes_accessed=int(2 * n_main * itemsize))
    partials = pl.pallas_call(
        kernel,
        out_shape=jax.ShapeDtypeStruct((num_blocks * 8, _LANE), jnp.float32),
        grid_spec=pltpu.PrefetchScalarGridSpec(
            num_scalar_prefetch=0,
            grid=grid,
            in_specs=in_specs,
            out_specs=pl.BlockSpec((8, _LANE), lambda i: (i, 0)),
        ),
        compiler_params=compiler_params,
        cost_estimate=cost,
    )(x2, t2)

    total = partials.sum()                      # tiny (num_blocks*8, 128) array
    if has_tail:
        total = total + _tail_loss().sum()
    if reduction == "mean":
        total = total / n
    return total.astype(dtype)


def _reference_focal_loss(inputs, targets, alpha=0.25, gamma=2.0,
                          reduction="none"):
    """Pure-JAX reference matching the PyTorch module."""
    p = jax.nn.sigmoid(inputs)
    ce = (jnp.maximum(inputs, 0.0) - inputs * targets
          + jnp.log1p(jnp.exp(-jnp.abs(inputs))))
    p_t = p * targets + (1.0 - p) * (1.0 - targets)
    loss = ce * (1.0 - p_t) ** gamma
    if alpha >= 0:
        alpha_t = alpha * targets + (1.0 - alpha) * (1.0 - targets)
        loss = alpha_t * loss
    if reduction == "mean":
        return loss.mean()
    if reduction == "sum":
        return loss.sum()
    return loss


if __name__ == "__main__":
    key = jax.random.PRNGKey(0)
    k_x, k_t, k_x2, k_t2, k_x3, k_t3 = jax.random.split(key, 6)

    # NCHW-like detection logits (2, 4, 16, 16), default module config.
    shape = (2, 4, 16, 16)
    x = jax.random.normal(k_x, shape, dtype=jnp.float32)
    t = jax.random.bernoulli(k_t, p=0.3, shape=shape).astype(jnp.float32)

    out_none = sigmoid_focal_loss(x, t, alpha=0.25, gamma=2.0, reduction="none")
    out_mean = sigmoid_focal_loss(x, t, alpha=0.25, gamma=2.0, reduction="mean")
    out_sum = sigmoid_focal_loss(x, t, alpha=0.25, gamma=2.0, reduction="sum")
    jax.block_until_ready((out_none, out_mean, out_sum))

    ref_none = _reference_focal_loss(x, t, 0.25, 2.0, "none")
    ref_mean = _reference_focal_loss(x, t, 0.25, 2.0, "mean")
    ref_sum = _reference_focal_loss(x, t, 0.25, 2.0, "sum")
    assert out_none.shape == shape and out_none.dtype == jnp.float32
    assert jnp.allclose(out_none, ref_none, atol=1e-5, rtol=1e-5)
    assert jnp.allclose(out_mean, ref_mean, atol=1e-6, rtol=1e-4)
    assert jnp.allclose(out_sum, ref_sum, atol=1e-3, rtol=1e-4)

    # Ragged shape (n % 128 != 0, > 128): exercises the last-block row mask,
    # the JAX tail path and 'none' concatenation; also alpha=-1 / non-int gamma.
    shape2 = (3, 7, 13)          # 273 elements -> 2 full rows + 17-elem tail
    x2 = jax.random.normal(k_x2, shape2, dtype=jnp.float32)
    t2 = jax.random.bernoulli(k_t2, p=0.5, shape=shape2).astype(jnp.float32)
    for a, g in ((0.25, 2.0), (-1.0, 1.5)):
        o_n = sigmoid_focal_loss(x2, t2, alpha=a, gamma=g, reduction="none")
        o_s = sigmoid_focal_loss(x2, t2, alpha=a, gamma=g, reduction="sum")
        jax.block_until_ready((o_n, o_s))
        r_n = _reference_focal_loss(x2, t2, a, g, "none")
        r_s = _reference_focal_loss(x2, t2, a, g, "sum")
        assert jnp.allclose(o_n, r_n, atol=1e-5, rtol=1e-5)
        assert jnp.allclose(o_s, r_s, atol=1e-3, rtol=1e-4)

    # Medium ragged size: multi-block grid with a masked last block + JAX tail.
    shape3 = (25610, 5)          # 128050 elements -> 1000 rows + 50-elem tail
    x3 = jax.random.normal(k_x3, shape3, dtype=jnp.float32)
    t3 = jax.random.bernoulli(k_t3, p=0.25, shape=shape3).astype(jnp.float32)
    o3_n = sigmoid_focal_loss(x3, t3, alpha=0.25, gamma=2.0, reduction="none")
    o3_m = sigmoid_focal_loss(x3, t3, alpha=0.25, gamma=2.0, reduction="mean")
    jax.block_until_ready((o3_n, o3_m))
    r3_n = _reference_focal_loss(x3, t3, 0.25, 2.0, "none")
    r3_m = _reference_focal_loss(x3, t3, 0.25, 2.0, "mean")
    assert jnp.allclose(o3_n, r3_n, atol=1e-5, rtol=1e-5)
    assert jnp.allclose(o3_m, r3_m, atol=1e-6, rtol=2e-4)

    print("KERNEL_OK")
</pallas_src>

<mosaic_0001>
module attributes {stable_mosaic.version = 11 : i64} {
  func.func @_elementwise_kernel(%arg0: i32, %arg1: memref<8x128xf32, #tpu.memory_space<vmem>>, %arg2: memref<8x128xf32, #tpu.memory_space<vmem>>, %arg3: memref<8x128xf32, #tpu.memory_space<vmem>>) attributes {dimension_semantics = [#tpu.dimension_semantics<parallel>], iteration_bounds = array<i64: 2>, scalar_prefetch = 0 : i64, scratch_operands = 0 : i64, tpu.core_type = #tpu.core_type<tc>, window_params = [{transform_indices = @transform_0, window_bounds = array<i64: 8, 128>}, {transform_indices = @transform_1, window_bounds = array<i64: 8, 128>}, {transform_indices = @transform_2, window_bounds = array<i64: 8, 128>}]} {
    %c0 = arith.constant 0 : index
    %c0_0 = arith.constant 0 : index
    %0 = vector.load %arg1[%c0, %c0_0] : memref<8x128xf32, #tpu.memory_space<vmem>>, vector<8x128xf32>
    %c0_1 = arith.constant 0 : index
    %c0_2 = arith.constant 0 : index
    %1 = vector.load %arg2[%c0_1, %c0_2] : memref<8x128xf32, #tpu.memory_space<vmem>>, vector<8x128xf32>
    %2 = math.absf %0 : vector<8x128xf32>
    %cst = arith.constant 0.000000e+00 : f32
    %3 = vector.broadcast %cst : f32 to vector<8x128xf32>
    %4 = arith.subf %3, %2 : vector<8x128xf32>
    %5 = math.exp %4 : vector<8x128xf32>
    %cst_3 = arith.constant 1.000000e+00 : f32
    %6 = vector.broadcast %cst_3 : f32 to vector<8x128xf32>
    %7 = arith.addf %6, %5 : vector<8x128xf32>
    %cst_4 = arith.constant 1.000000e+00 : f32
    %8 = vector.broadcast %cst_4 : f32 to vector<8x128xf32>
    %9 = arith.divf %8, %7 : vector<8x128xf32>
    %cst_5 = arith.constant 0.000000e+00 : f32
    %10 = vector.broadcast %cst_5 : f32 to vector<8x128xf32>
    %11 = arith.cmpf oge, %0, %10 : vector<8x128xf32>
    %cst_6 = arith.constant 1.000000e+00 : f32
    %12 = vector.broadcast %cst_6 : f32 to vector<8x128xf32>
    %13 = arith.select %11, %12, %5 : vector<8x128xi1>, vector<8x128xf32>
    %14 = arith.mulf %13, %9 : vector<8x128xf32>
    %cst_7 = arith.constant 0.000000e+00 : f32
    %15 = vector.broadcast %cst_7 : f32 to vector<8x128xf32>
    %16 = arith.maximumf %0, %15 : vector<8x128xf32>
    %17 = arith.mulf %0, %1 : vector<8x128xf32>
    %18 = arith.subf %16, %17 : vector<8x128xf32>
    %19 = math.log1p %5 : vector<8x128xf32>
    %20 = arith.addf %18, %19 : vector<8x128xf32>
    %21 = arith.addf %14, %1 : vector<8x128xf32>
    %22 = arith.mulf %14, %1 : vector<8x128xf32>
    %cst_8 = arith.constant 2.000000e+00 : f32
    %23 = vector.broadcast %cst_8 : f32 to vector<8x128xf32>
    %24 = arith.mulf %23, %22 : vector<8x128xf32>
    %25 = arith.subf %21, %24 : vector<8x128xf32>
    %26 = arith.mulf %25, %25 : vector<8x128xf32>
    %27 = arith.mulf %20, %26 : vector<8x128xf32>
    %cst_9 = arith.constant -5.000000e-01 : f32
    %28 = vector.broadcast %cst_9 : f32 to vector<8x128xf32>
    %29 = arith.mulf %28, %1 : vector<8x128xf32>
    %cst_10 = arith.constant 7.500000e-01 : f32
    %30 = vector.broadcast %cst_10 : f32 to vector<8x128xf32>
    %31 = arith.addf %30, %29 : vector<8x128xf32>
    %32 = arith.mulf %31, %27 : vector<8x128xf32>
    %c0_11 = arith.constant 0 : index
    %c0_12 = arith.constant 0 : index
    %33 = vector.load %arg3[%c0_11, %c0_12] : memref<8x128xf32, #tpu.memory_space<vmem>>, vector<8x128xf32>
    tpu.vector_store %arg3[%c0_11, %c0_12], %32 {strides = array<i32>} : memref<8x128xf32, #tpu.memory_space<vmem>>, vector<8x128xf32>,
    return
  }
  func.func @transform_0(%arg0: i32) -> (i32, i32) {
    %c0_i32 = arith.constant 0 : i32
    %c0_i32_0 = arith.constant 0 : i32
    return %arg0, %c0_i32 : i32, i32
  }
  func.func @transform_1(%arg0: i32) -> (i32, i32) {
    %c0_i32 = arith.constant 0 : i32
    %c0_i32_0 = arith.constant 0 : i32
    return %arg0, %c0_i32 : i32, i32
  }
  func.func @transform_2(%arg0: i32) -> (i32, i32) {
    %c0_i32 = arith.constant 0 : i32
    %c0_i32_0 = arith.constant 0 : i32
    return %arg0, %c0_i32 : i32, i32
  }
}

</mosaic_0001>

<bundles_post_ra>
// kernel: tpu_custom_call.1
= control target key start
LH: loop header
LB: loop body
LE: loop exit
PB: predicated region body
PF: predicated region fallthrough
CT: control target
= control target key end

     0   :  { %7 = vsyncpa [#allocation3], 0  ;;  %s774_s0 = inlined_call_operand.hbm [shape: f32[16,128], index: 0, kind: input, shape index: {}]   ;;  %s775_s1 = inlined_call_operand.hbm [shape: f32[16,128], index: 1, kind: input, shape index: {}]   ;;  %s776_s2 = inlined_call_operand.hbm [shape: f32[16,128], index: 2, kind: output, shape index: {}]  }
   0x1   :  { %9 = vsyncpa [#allocation3 + $0x1], 0 }
   0x2   :  { %10 = vsyncpa [#allocation6], 0 }
   0x3   :  { %12 = vsyncpa [#allocation6 + $0x1], 0 }
   0x4   :  { %13 = vsyncpa [#allocation4], 0 }
   0x5   :  { %15 = vsyncpa [#allocation4 + $0x1], 0  ;;  %s560_s9 = smov 0   ;;  %s562_s10 = smov 0  }
   0x6   :  { %s564_s11 = smov 0   ;;  %s566_s12 = smov 0  }
   0x7 LB: > { %s581_s13 = sadd.s32 4294967295, %s540_s12   ;;  %s338_s14 = sadd.s32 4294967294, %s540_s12   ;;  %s540_s12 = sphi %s566_s12, %s795_s12   ;;  %s536_s11 = sphi %s564_s11, %s794_s11   ;;  %s532_s10 = sphi %s562_s10, %s793_s10   ;;  %s528_s9 = sphi %s560_s9, %s792_s9  }
   0x8   : > { %s585_s15 = sadd.s32 1, %s540_s12   ;;  %s28_s16 = sadd.s32 1, %s536_s11 }
   0x9   : > { %s25_s17 = ssub.s32 %s540_s12, %s585_s15  ;;  %p35_p0 = scmp.ne.s32.totalorder %s536_s11, %s532_s10 }
   0xa   : > { %p26_p1 = scmp.eq.s32.totalorder %s25_s17, 0  ;;  %p36_p2 = scmp.eq.s32.totalorder %s540_s12, 0 }
   0xb   : > { %p41_p3 = scmp.ne.s32.totalorder %s532_s10, %s528_s9  ;;  %p42_p4 = scmp.eq.s32.totalorder %s581_s13, 0 }
   0xc   : > { %s597_s18 = scalar_select %p26_p1, %s536_s11, %s28_s16  }
   0xd   : > { %p599_p5 = por %p36_p2, %p35_p0  ;;  %p603_p6 = por %p42_p4, %p41_p3 }
   0xe   : > { %p91_p7 = scmp.eq.s32.totalorder %s581_s13, 1  ;;  %p97_p8 = scmp.eq.s32.totalorder %s338_s14, 1 }
   0xf   : > { %s780_s20 = scalar_select %p603_p6, 1, 0 }
  0x10   : > { %p370_p10 = scmp.lt.s32.totalorder %s540_s12, 2  ;;  %p610_p11 = por %p91_p7, %p35_p0 }
  0x11   : > { %p614_p12 = por %p97_p8, %p41_p3  ;;  %s619_s23 = sand.u32 1, %s536_s11  }
  0x12   : > { %s781_s21 = scalar_select %p610_p11, 1, 0 }
  0x13   : > { %s782_s22 = scalar_select %p614_p12, 1, 0 }
  0x14   : > { %s342_s24 = sshll.u32 %s540_s12, 7  ;;  %s341_s25 = sshll.u32 %s619_s23, 3 }
  0x15   : > { %s628_s28 = scalar_lea.hbm %s774_s0, %s342_s24  ;;  %s121_s29 = scalar_lea.vmem [#allocation2], %s341_s25 }
  0x16   : > { %s128_s30 = sshll.u32 %s121_s29, 4  ;;  %p634_p13 = pnand %p370_p10, %p599_p5  ;;  %s638_s30 = int_to_ptr.vmem [resolvable:$true] %s128_s30 }
  0x17   : > { %s118_s4 = scalar_lea.sflag [#allocation3], %s619_s23  ;;  %s410_s5 = scalar_lea.hbm %s628_s28, 128 }
  0x18   : > { %p411_p2 = scmp.ne.s32.totalorder %s628_s28, %s410_s5  ;;  %p412_p3 = pneg %p634_p13 }
  0x19   : > { %s415_s8 = scalar_lea.hbm %s774_s0, 256  ;;  %p416_p5 = scmp.lt.u32.totalorder %s628_s28, %s774_s0 }
  0x1a   : > { %p413_p4 = pnand %p412_p3, %p411_p2  ;;  %p417_p8 = scmp.lt.u32.totalorder %s415_s8, %s410_s5 }
  0x1b   : > { %p419_p9 = scmp.lt.u32.totalorder %s410_s5, %s628_s28 }
  0x1c   : > { %p414_p7 = pneg %p413_p4  ;;  %p418_p10 = por %p417_p8, %p416_p5 }
  0x1e   : > { %p420_p0 = por %p419_p9, %p418_p10 }
  0x20   : > { %p421_p1 = pnand %p420_p0, %p414_p7 }
  0x22   : > { %424 = shalt.err (!%p421_p1)
}
  0x23   : > { %s425_s17 = scalar_lea.vmem %s638_s30, 128  ;;  %s542_s19 = smov [#allocation2]  }
  0x24   : > { %p426_p2 = scmp.ne.s32.totalorder %s638_s30, %s425_s17  ;;  %s430_s26 = sshll.u32 %s542_s19, 4  ;;  %s431_s26 = int_to_ptr.vmem [resolvable:$false] %s430_s26 }
  0x25   : > { %s432_s27 = scalar_lea.vmem %s431_s26, 256  ;;  %p433_p11 = scmp.lt.s32.totalorder %s638_s30, %s431_s26 }
  0x26   : > { %p428_p4 = pnand %p426_p2, %p412_p3  ;;  %p434_p5 = scmp.lt.s32.totalorder %s432_s27, %s425_s17 }
  0x28   : > { %p429_p12 = pneg %p428_p4  ;;  %p435_p8 = por %p434_p5, %p433_p11 }
  0x2a   : > { %p436_p9 = pnand %p435_p8, %p429_p12 }
  0x2c   : > { %439 = shalt.err (!%p436_p9)
}
  0x2d   : > { %362 = dma.hbm_to_vmem [thread:$0]  (!%p634_p13), %s628_s28, 128, %s638_s30, %s118_s4  }
  0x2e   : > { %p784_p0 = scmp.lt.s32.totalorder %s540_s12, 3  ;;  %p785_p1 = scmp.ge.s32.totalorder %s540_s12, 1 }
  0x2f   : > { %s681_s7 = scalar_lea.hbm %s775_s1, %s342_s24  ;;  %s139_s8 = scalar_lea.vmem [#allocation5], %s341_s25 }
  0x30   : > { %p672_p7 = pnand %p785_p1, %p784_p0  ;;  %s146_s14 = sshll.u32 %s139_s8, 4  ;;  %s147_s14 = int_to_ptr.vmem [resolvable:$true] %s146_s14 }
  0x31   : > { %s136_s28 = scalar_lea.sflag [#allocation6], %s619_s23  ;;  %s440_s30 = scalar_lea.hbm %s681_s7, 128 }
  0x32   : > { %s786_s29 = scalar_select %p672_p7, 1, 0 }
  0x33   : > { %p441_p11 = scmp.ne.s32.totalorder %s681_s7, %s440_s30  ;;  %s445_s24 = scalar_lea.hbm %s775_s1, 256 }
  0x34   : > { %p446_p2 = scmp.lt.u32.totalorder %s681_s7, %s775_s1  ;;  %p447_p4 = scmp.lt.u32.totalorder %s445_s24, %s440_s30 }
  0x35   : > { %p443_p12 = pnand %p441_p11, %p412_p3  ;;  %p449_p8 = scmp.lt.u32.totalorder %s440_s30, %s681_s7 }
  0x36   : > { %p448_p5 = por %p447_p4, %p446_p2 }
  0x37   : > { %p444_p10 = pneg %p443_p12 }
  0x38   : > { %p450_p9 = por %p449_p8, %p448_p5 }
  0x3a   : > { %p451_p0 = pnand %p450_p9, %p444_p10 }
  0x3c   : > { %454 = shalt.err (!%p451_p0)
}
  0x3d   : > { %s455_s23 = scalar_lea.vmem %s147_s14, 128  ;;  %s543_s25 = smov [#allocation5]  }
  0x3e   : > { %p456_p1 = scmp.ne.s32.totalorder %s147_s14, %s455_s23  ;;  %s460_s26 = sshll.u32 %s543_s25, 4  ;;  %s461_s26 = int_to_ptr.vmem [resolvable:$false] %s460_s26 }
  0x3f   : > { %s462_s27 = scalar_lea.vmem %s461_s26, 256  ;;  %p463_p6 = scmp.lt.s32.totalorder %s147_s14, %s461_s26 }
  0x40   : > { %p458_p11 = pnand %p456_p1, %p412_p3  ;;  %p464_p7 = scmp.lt.s32.totalorder %s462_s27, %s455_s23 }
  0x42   : > { %p459_p12 = pneg %p458_p11  ;;  %p465_p2 = por %p464_p7, %p463_p6 }
  0x44   : > { %p466_p4 = pnand %p465_p2, %p459_p12 }
  0x46   : > { %469 = shalt.err (!%p466_p4)
}
  0x47   : > { %365 = dma.hbm_to_vmem [thread:$0]  (!%p634_p13), %s681_s7, 128, %s147_s14, %s136_s28  }
  0x48   : > { %p787_p10 = scmp.ne.s32.totalorder %s786_s29, 0 }
  0x49   : > { %s708_s5 = sand.u32 (!%p787_p10), 1, %s532_s10   ;;  %p788_p6 = scmp.ne.s32.totalorder (!%p787_p10), %s780_s20, 0 }
  0x4a   : > { %155 = sbr.rel (%p787_p10) target bundleno = 143 (0x8f), region = 28  ;;  %s711_s6 = sshll.u32 (!%p787_p10), %s708_s5, 3 }
  0x4b   : > { %s158_s8 = scalar_lea.sflag (!%p787_p10), [#allocation3], %s708_s5  ;;  %s161_s30 = scalar_lea.vmem (!%p787_p10), [#allocation2], %s711_s6 }
  0x51   : > { %515 = dma.done.wait (%p788_p6), %s158_s8, 128  }
  0x52   : > { %517 = vsyncadd (%p788_p6), %s158_s8, 4294967168  ;;  %s167_s3 = scalar_lea.sflag [#allocation6], %s708_s5  ;;  %s170_s29 = scalar_lea.vmem [#allocation5], %s711_s6 }
  0x53   : > { %519 = dma.done.wait (%p788_p6), %s167_s3, 128  }
  0x54   : > { %521 = vsyncadd (%p788_p6), %s167_s3, 4294967168  ;;  %v196_v0 = vld [vmem:[%s161_s30] sm:$0xff]  ;;  %v197_v9 = vld [vmem:[%s170_s29] sm:$0xff]  ;;  %s195_s20 = scalar_lea.vmem [#allocation7], %s711_s6  ;;  %s350_s14 = sshll.u32 %s581_s13, 7 }
  0x55   : > { %v198_v1 = vand.u32 2147483647, %v196_v0  ;;  %vm205_vm0 = vcmp.ge.f32.partialorder %v196_v0, 0.0  ;;  %v208_v11 = vmax.f32 %v196_v0, 0.0  ;;  %v209_v12 = vmul.f32 %v197_v9, %v196_v0  ;;  %s245_s7 = sshll.u32 %s195_s20, 4  ;;  %s732_s16 = scalar_lea.hbm %s776_s2, %s350_s14  ;;  %s727_s7 = int_to_ptr.vmem [resolvable:$true] %s245_s7 }
  0x56   : > { %v227_v23 = vmul.f32 -0.5, %v197_v9  ;;  %s232_s24 = scalar_lea.sflag [#allocation4], %s708_s5  ;;  %s470_s17 = scalar_lea.vmem %s727_s7, 128 }
  0x57   : > { %v199_v2 = vsub.f32 0.0, %v198_v1  ;;  %v210_v18 = vsub.f32 %v208_v11, %v209_v12  ;;  %p471_p13 = scmp.ne.s32.totalorder %s727_s7, %s470_s17  ;;  %p789_p3 = scmp.ne.s32.totalorder %s781_s21, 0 }
  0x58   : > { %v228_v27 = vadd.f32 0.75, %v227_v23  ;;  %s544_s13 = smov [#allocation7]  }
  0x59   : > { %v200_v3 = vmul.f32 1.442695, %v199_v2  ;;  %p472_p7 = pnand %p471_p13, %p789_p3  ;;  %s474_s19 = sshll.u32 %s544_s13, 4  ;;  %s475_s19 = int_to_ptr.vmem [resolvable:$false] %s474_s19 }
  0x5a   : > { %s476_s23 = scalar_lea.vmem %s475_s19, 256  ;;  %p477_p8 = scmp.lt.s32.totalorder %s727_s7, %s475_s19 }
  0x5b   : > { %404 = vpow2.f32 %v200_v3  ;;  %p473_p5 = pneg %p472_p7  ;;  %p478_p9 = scmp.lt.s32.totalorder %s476_s23, %s470_s17 }
  0x5d   : > { %p479_p0 = por %p478_p9, %p477_p8 }
  0x5f   : > { %p480_p1 = pnand %p479_p0, %p473_p5 }
  0x65   : > { %v405_v4 = vpop.eup %404 }
  0x66   : > { %v202_v5 = vadd.f32 1.0, %v405_v4  ;;  %v214_v6 = vmul.f32 -0.5, %v405_v4  ;;  %v217_v8 = vand.u32 2147483647, %v405_v4  ;;  %v206_v10 = vsel %vm205_vm0, 1.0, %v405_v4 }
  0x68   : > { %406 = vrcp.f32 %v202_v5  ;;  %v215_v7 = vadd.f32 1.0, %v214_v6  ;;  %vm218_vm1 = vcmp.lt.f32.partialorder %v217_v8, 0.0004427343 }
  0x69   : > { %408 = vlog2.f32 %v202_v5 }
  0x6a   : > { %v216_v14 = vmul.f32 %v405_v4, %v215_v7 }
  0x72   : > { %v407_v13 = vpop.eup %406 }
  0x73   : > { %v409_v15 = vpop.eup %408  ;;  %v207_v16 = vmul.f32 %v407_v13, %v206_v10 }
  0x74   : > { %v213_v17 = vmul.f32 0.6931472, %v409_v15 }
  0x75   : > { %v221_v19 = vadd.f32 %v207_v16, %v197_v9  ;;  %v222_v20 = vmul.f32 %v207_v16, %v197_v9 }
  0x76   : > { %v219_v21 = vsel %vm218_vm1, %v216_v14, %v213_v17 }
  0x77   : > { %v223_v22 = vmul.f32 2.0, %v222_v20  ;;  %v220_v24 = vadd.f32 %v219_v21, %v210_v18 }
  0x79   : > { %v224_v25 = vsub.f32 %v221_v19, %v223_v22 }
  0x7b   : > { %v225_v26 = vmul.f32 %v224_v25, %v224_v25 }
  0x7d   : > { %v226_v28 = vmul.f32 %v225_v26, %v220_v24 }
  0x7f   : > { %v229_v29 = vmul.f32 %v228_v27, %v226_v28 }
  0x81   : > { %230 = vst [vmem:[%s195_s20] sm:$0xff] %v229_v29 }
  0x82   : > { %483 = shalt.err (!%p480_p1)
}
  0x83   : > { %s484_s25 = scalar_lea.hbm %s732_s16, 128  ;;  %s488_s5 = scalar_lea.hbm %s776_s2, 256 }
  0x84   : > { %p485_p11 = scmp.ne.s32.totalorder %s732_s16, %s484_s25  ;;  %p489_p4 = scmp.lt.u32.totalorder %s732_s16, %s776_s2 }
  0x85   : > { %p490_p10 = scmp.lt.u32.totalorder %s488_s5, %s484_s25  ;;  %p492_p13 = scmp.lt.u32.totalorder %s484_s25, %s732_s16 }
  0x86   : > { %p486_p12 = pnand %p485_p11, %p789_p3 }
  0x87   : > { %p491_p6 = por %p490_p10, %p489_p4 }
  0x88   : > { %p487_p2 = pneg %p486_p12 }
  0x89   : > { %p493_p7 = por %p492_p13, %p491_p6 }
  0x8b   : > { %p494_p5 = pnand %p493_p7, %p487_p2 }
  0x8d   : > { %497 = shalt.err (!%p494_p5)
}
  0x8e   : > { %357 = dma.vmem_to_hbm [thread:$0]  (%p789_p3), %s727_s7, 128, %s732_s16, %s232_s24  }
  0x8f PF: > { %s257_s30 = sand.u32 1, %s528_s9   ;;  %p790_p8 = scmp.ne.s32.totalorder %s782_s22, 0 }
  0x90   : > { %p791_p9 = scmp.ge.s32.totalorder %s540_s12, 2  ;;  %s258_s3 = scalar_lea.sflag [#allocation4], %s257_s30 }
  0x92   : > { %p367_p0 = pnand %p791_p9, %p790_p8 }
  0x94   : > { %523 = dma.done.wait (!%p367_p0), %s258_s3, 128  }
  0x95   : > { %525 = vsyncadd (!%p367_p0), %s258_s3, 4294967168  ;;  %p18_p1 = scmp.ge.s32.totalorder %s585_s15, 4   ;;  %s792_s9 = smov %s532_s10 }
  0x96   : > { %s793_s10 = smov %s536_s11  ;;  %s794_s11 = smov %s597_s18 }
  0x97   : > { %s795_s12 = smov %s585_s15  ;;  %20 = sbr.rel (!%p18_p1) target bundleno = 7 (0x7), region = 86 }
  0x9e   :  { %263 = vsyncpa [#allocation3], 1 }
  0x9f   :  { %265 = vsyncpa [#allocation3 + $0x1], 1 }
  0xa0   :  { %266 = vsyncpa [#allocation6], 1 }
  0xa1   :  { %268 = vsyncpa [#allocation6 + $0x1], 1 }
  0xa2   :  { %269 = vsyncpa [#allocation4], 1 }
  0xa3   :  { %271 = vsyncpa [#allocation4 + $0x1], 1 }

</bundles_post_ra>
